<compile_context>
chip_gen: v6e
topology: v6e:2x2x1
jax: 0.10.0
libtpu: 0.0.40
codegen_flags: <defaults>
</compile_context>

<pallas_src>
import jax
import jax.numpy as jnp
from jax.experimental import pallas as pl
from jax.experimental.pallas import tpu as pltpu


# ----------------------------- fused Pallas kernel -----------------------------

def _enc_n_down_kernel(p_ref, cw_ref, cb_ref, w1_ref, b1_ref, w2_ref, b2_ref, o_ref):
    """One batch sample per grid step; all intermediates stay in VMEM/vregs.

    p_ref  : [1, Cin*9, 4*S]  im2col patches, columns ordered (quadrant q, ho, wo)
    cw_ref : [Cout, Cin*9]    conv weight as matmul LHS (rows match (ci, kh, kw))
    cb_ref : [Cout, 1]        conv bias
    w1_ref : [Cout*S, hidden] first Linear, rows ordered co*S + s (PyTorch flatten)
    b1_ref : [1, hidden]
    w2_ref : [hidden, n_out]  second Linear
    b2_ref : [1, n_out]
    o_ref  : [1, 1, n_out]
    """
    cout = cw_ref.shape[0]
    s = p_ref.shape[2] // 4          # Ho*Wo spatial positions per pool quadrant
    hidden = b1_ref.shape[1]

    # Conv2d(3x3, pad=1) as a single lane-dense MXU matmul, then bias + ReLU.
    conv = jnp.dot(cw_ref[...], p_ref[0], preferred_element_type=jnp.float32)  # [Cout, 4*S]
    conv = jnp.maximum(conv + cb_ref[...], 0.0)

    # MaxPool2d(2): columns are grouped by 2x2 quadrant -> elementwise max of 4 slabs.
    pooled = jnp.maximum(
        jnp.maximum(conv[:, 0 * s:1 * s], conv[:, 1 * s:2 * s]),
        jnp.maximum(conv[:, 2 * s:3 * s], conv[:, 3 * s:4 * s]),
    )                                                                            # [Cout, S]

    # Linear(feat -> hidden): contract (channel, spatial) against w1 rows co*S + s
    # without materializing the flattened [1, feat] code (avoids in-kernel relayout).
    h = jnp.zeros((1, hidden), jnp.float32)
    for co in range(cout):           # static unroll over Cout
        h = h + jnp.dot(pooled[co:co + 1, :],
                        w1_ref[pl.ds(co * s, s), :],
                        preferred_element_type=jnp.float32)
    h = jnp.maximum(h + b1_ref[...], 0.0)                                        # [1, hidden]

    # Linear(hidden -> n_out)
    out = jnp.dot(h, w2_ref[...], preferred_element_type=jnp.float32) + b2_ref[...]
    o_ref[0] = out.astype(o_ref.dtype)


# ------------------------------ JAX glue ----------------------------------

def _im2col_pool_grouped(x):
    """NCHW -> [N, Cin*9, 4*Ho*Wo] patches for the lane-dense conv matmul.

    Row order is (ci, kh, kw), matching PyTorch Conv2d weight [Cout, Cin, kh, kw].
    Column order is (q, ho, wo) with q = (h%2)*2 + (w%2), so the in-kernel 2x2
    maxpool is an elementwise max of 4 contiguous lane slabs (no strided slices).
    """
    N, C, H, W = x.shape
    Ho, Wo = H // 2, W // 2
    xp = jnp.pad(x, ((0, 0), (0, 0), (1, 1), (1, 1)))
    taps = [xp[:, :, di:di + H, dj:dj + W] for di in range(3) for dj in range(3)]
    p = jnp.stack(taps, axis=2)                       # [N, C, 9, H, W]
    p = p.reshape(N, C, 9, Ho, 2, Wo, 2)              # h = 2*ho + qh, w = 2*wo + qw
    p = p.transpose(0, 1, 2, 4, 6, 3, 5)              # [N, C, 9, qh, qw, Ho, Wo]
    return p.reshape(N, C * 9, 4 * Ho * Wo)
    # TODO(synk): at larger N/H/W, move this im2col into the kernel (shifted VMEM
    # taps from a padded block) to avoid materializing the 9x-expanded patches in HBM.


def enc_n_down_forward(X, params):
    """Forward pass of Enc_n_Down: downstream(pretrain_enc.embed(X)), fully fused."""
    N, Cin, H, W = X.shape
    Cout = params["conv_w"].shape[0]
    Ho, Wo = H // 2, W // 2
    S = Ho * Wo
    feat, hidden = params["w1"].shape
    n_out = params["w2"].shape[1]
    assert feat == Cout * S
    ck = Cin * 9

    patches = _im2col_pool_grouped(X)                     # [N, Cin*9, 4*S]
    wmat = params["conv_w"].reshape(Cout, ck)             # conv weight as matmul LHS
    cbias = params["conv_b"].reshape(Cout, 1)

    out = pl.pallas_call(
        _enc_n_down_kernel,
        out_shape=jax.ShapeDtypeStruct((N, 1, n_out), jnp.float32),
        grid=(N,),
        in_specs=[
            pl.BlockSpec((1, ck, 4 * S), lambda i: (i, 0, 0)),   # per-sample patches
            pl.BlockSpec((Cout, ck), lambda i: (0, 0)),          # conv weight (VMEM-resident)
            pl.BlockSpec((Cout, 1), lambda i: (0, 0)),           # conv bias
            pl.BlockSpec((feat, hidden), lambda i: (0, 0)),      # w1
            pl.BlockSpec((1, hidden), lambda i: (0, 0)),         # b1
            pl.BlockSpec((hidden, n_out), lambda i: (0, 0)),     # w2
            pl.BlockSpec((1, n_out), lambda i: (0, 0)),          # b2
        ],
        out_specs=pl.BlockSpec((1, 1, n_out), lambda i: (i, 0, 0)),
        compiler_params=pltpu.CompilerParams(
            dimension_semantics=("parallel",),    # v7x: both TCs split the batch
            vmem_limit_bytes=32 * 1024 * 1024,
        ),
    )(patches, wmat, cbias,
      params["w1"], params["b1"].reshape(1, hidden),
      params["w2"], params["b2"].reshape(1, n_out))
    return out.reshape(N, n_out)

    # TODO(synk): compute_loss / compute_acc are training-time delegations to the
    # downstream module and are not part of the forward pass; not implemented.


def _reference(X, params):
    """Pure-JAX reference with the same math as the PyTorch module."""
    N = X.shape[0]
    Cout = params["conv_w"].shape[0]
    conv = jax.lax.conv_general_dilated(
        X, params["conv_w"], window_strides=(1, 1), padding=((1, 1), (1, 1)),
        dimension_numbers=("NCHW", "OIHW", "NCHW"))
    conv = jax.nn.relu(conv + params["conv_b"].reshape(1, Cout, 1, 1))
    Nn, Cc, Hh, Ww = conv.shape
    pooled = conv.reshape(Nn, Cc, Hh // 2, 2, Ww // 2, 2).max(axis=(3, 5))
    code = pooled.reshape(N, -1)
    h = jax.nn.relu(code @ params["w1"] + params["b1"])
    return h @ params["w2"] + params["b2"]


# ------------------------------ main --------------------------------------

if __name__ == "__main__":
    key = jax.random.PRNGKey(0)
    kx, k1, k2, k3, k4, k5, k6 = jax.random.split(key, 7)

    N, Cin, H, W = 2, 4, 16, 16
    Cout, hidden, n_out = 8, 32, 3
    feat = Cout * (H // 2) * (W // 2)  # 512

    X = jax.random.normal(kx, (N, Cin, H, W), jnp.float32)
    params = {
        "conv_w": 0.1 * jax.random.normal(k1, (Cout, Cin, 3, 3), jnp.float32),
        "conv_b": 0.1 * jax.random.normal(k2, (Cout,), jnp.float32),
        "w1": 0.05 * jax.random.normal(k3, (feat, hidden), jnp.float32),
        "b1": 0.05 * jax.random.normal(k4, (hidden,), jnp.float32),
        "w2": 0.1 * jax.random.normal(k5, (hidden, n_out), jnp.float32),
        "b2": 0.1 * jax.random.normal(k6, (n_out,), jnp.float32),
    }

    out = jax.block_until_ready(jax.jit(enc_n_down_forward)(X, params))
    assert out.shape == (N, n_out), out.shape

    # Sanity check vs. pure-JAX reference (loose tolerance to allow MXU precision).
    ref = _reference(X, params)
    assert jnp.allclose(out, ref, rtol=2e-2, atol=2e-2), float(jnp.max(jnp.abs(out - ref)))

    print("KERNEL_OK")
</pallas_src>

<mosaic_0001>
module attributes {stable_mosaic.version = 11 : i64} {
  func.func @_enc_n_down_kernel(%arg0: i32, %arg1: memref<1x36x256xf32, #tpu.memory_space<vmem>>, %arg2: memref<8x36xf32, #tpu.memory_space<vmem>>, %arg3: memref<8x1xf32, #tpu.memory_space<vmem>>, %arg4: memref<512x32xf32, #tpu.memory_space<vmem>>, %arg5: memref<1x32xf32, #tpu.memory_space<vmem>>, %arg6: memref<32x3xf32, #tpu.memory_space<vmem>>, %arg7: memref<1x3xf32, #tpu.memory_space<vmem>>, %arg8: memref<1x1x3xf32, #tpu.memory_space<vmem>>) attributes {dimension_semantics = [#tpu.dimension_semantics<parallel>], iteration_bounds = array<i64: 2>, scalar_prefetch = 0 : i64, scratch_operands = 0 : i64, tpu.core_type = #tpu.core_type<tc>, window_params = [{transform_indices = @transform_0, window_bounds = array<i64: 1, 36, 256>}, {pipeline_mode = #tpu.pipeline_mode<synchronous>, transform_indices = @transform_1, window_bounds = array<i64: 8, 36>}, {pipeline_mode = #tpu.pipeline_mode<synchronous>, transform_indices = @transform_2, window_bounds = array<i64: 8, 1>}, {pipeline_mode = #tpu.pipeline_mode<synchronous>, transform_indices = @transform_3, window_bounds = array<i64: 512, 32>}, {pipeline_mode = #tpu.pipeline_mode<synchronous>, transform_indices = @transform_4, window_bounds = array<i64: 1, 32>}, {pipeline_mode = #tpu.pipeline_mode<synchronous>, transform_indices = @transform_5, window_bounds = array<i64: 32, 3>}, {pipeline_mode = #tpu.pipeline_mode<synchronous>, transform_indices = @transform_6, window_bounds = array<i64: 1, 3>}, {transform_indices = @transform_7, window_bounds = array<i64: 1, 1, 3>}]} {
    %c0 = arith.constant 0 : index
    %c0_0 = arith.constant 0 : index
    %0 = vector.load %arg2[%c0, %c0_0] : memref<8x36xf32, #tpu.memory_space<vmem>>, vector<8x36xf32>
    %c0_1 = arith.constant 0 : index
    %c0_2 = arith.constant 0 : index
    %c0_3 = arith.constant 0 : index
    %1 = vector.load %arg1[%c0_1, %c0_2, %c0_3] : memref<1x36x256xf32, #tpu.memory_space<vmem>>, vector<1x36x256xf32>
    %2 = vector.shape_cast %1 : vector<1x36x256xf32> to vector<36x256xf32>
    %cst = arith.constant dense<0.000000e+00> : vector<8x256xf32>
    %3 = tpu.matmul %0, %2, %cst {dimension_numbers = #tpu.dot_dimension_numbers<[1], [0], [0], [1], [0, 0, 1, 1], [], []>} : vector<8x36xf32>, vector<36x256xf32>, vector<8x256xf32> -> vector<8x256xf32>
    %c0_4 = arith.constant 0 : index
    %c0_5 = arith.constant 0 : index
    %4 = vector.load %arg3[%c0_4, %c0_5] : memref<8x1xf32, #tpu.memory_space<vmem>>, vector<8x1xf32>
    %5 = vector.broadcast %4 : vector<8x1xf32> to vector<8x256xf32>
    %6 = arith.addf %3, %5 : vector<8x256xf32>
    %cst_6 = arith.constant 0.000000e+00 : f32
    %7 = vector.broadcast %cst_6 : f32 to vector<8x256xf32>
    %8 = arith.maximumf %6, %7 : vector<8x256xf32>
    %9 = vector.extract_strided_slice %8 {offsets = [0, 0], sizes = [8, 64], strides = [1, 1]} : vector<8x256xf32> to vector<8x64xf32>
    %10 = vector.extract_strided_slice %8 {offsets = [0, 64], sizes = [8, 64], strides = [1, 1]} : vector<8x256xf32> to vector<8x64xf32>
    %11 = arith.maximumf %9, %10 : vector<8x64xf32>
    %12 = vector.extract_strided_slice %8 {offsets = [0, 128], sizes = [8, 64], strides = [1, 1]} : vector<8x256xf32> to vector<8x64xf32>
    %13 = vector.extract_strided_slice %8 {offsets = [0, 192], sizes = [8, 64], strides = [1, 1]} : vector<8x256xf32> to vector<8x64xf32>
    %14 = arith.maximumf %12, %13 : vector<8x64xf32>
    %15 = arith.maximumf %11, %14 : vector<8x64xf32>
    %cst_7 = arith.constant 0.000000e+00 : f32
    %16 = vector.broadcast %cst_7 : f32 to vector<1x32xf32>
    %17 = vector.extract_strided_slice %15 {offsets = [0, 0], sizes = [1, 64], strides = [1, 1]} : vector<8x64xf32> to vector<1x64xf32>
    %c0_8 = arith.constant 0 : index
    %c0_9 = arith.constant 0 : index
    %18 = vector.load %arg4[%c0_8, %c0_9] : memref<512x32xf32, #tpu.memory_space<vmem>>, vector<64x32xf32>
    %cst_10 = arith.constant dense<0.000000e+00> : vector<1x32xf32>
    %19 = tpu.matmul %17, %18, %cst_10 {dimension_numbers = #tpu.dot_dimension_numbers<[1], [0], [0], [1], [0, 0, 1, 1], [], []>} : vector<1x64xf32>, vector<64x32xf32>, vector<1x32xf32> -> vector<1x32xf32>
    %20 = arith.addf %16, %19 : vector<1x32xf32>
    %21 = vector.extract_strided_slice %15 {offsets = [1, 0], sizes = [1, 64], strides = [1, 1]} : vector<8x64xf32> to vector<1x64xf32>
    %c64 = arith.constant 64 : index
    %c0_11 = arith.constant 0 : index
    %22 = vector.load %arg4[%c64, %c0_11] : memref<512x32xf32, #tpu.memory_space<vmem>>, vector<64x32xf32>
    %cst_12 = arith.constant dense<0.000000e+00> : vector<1x32xf32>
    %23 = tpu.matmul %21, %22, %cst_12 {dimension_numbers = #tpu.dot_dimension_numbers<[1], [0], [0], [1], [0, 0, 1, 1], [], []>} : vector<1x64xf32>, vector<64x32xf32>, vector<1x32xf32> -> vector<1x32xf32>
    %24 = arith.addf %20, %23 : vector<1x32xf32>
    %25 = vector.extract_strided_slice %15 {offsets = [2, 0], sizes = [1, 64], strides = [1, 1]} : vector<8x64xf32> to vector<1x64xf32>
    %c128 = arith.constant 128 : index
    %c0_13 = arith.constant 0 : index
    %26 = vector.load %arg4[%c128, %c0_13] : memref<512x32xf32, #tpu.memory_space<vmem>>, vector<64x32xf32>
    %cst_14 = arith.constant dense<0.000000e+00> : vector<1x32xf32>
    %27 = tpu.matmul %25, %26, %cst_14 {dimension_numbers = #tpu.dot_dimension_numbers<[1], [0], [0], [1], [0, 0, 1, 1], [], []>} : vector<1x64xf32>, vector<64x32xf32>, vector<1x32xf32> -> vector<1x32xf32>
    %28 = arith.addf %24, %27 : vector<1x32xf32>
    %29 = vector.extract_strided_slice %15 {offsets = [3, 0], sizes = [1, 64], strides = [1, 1]} : vector<8x64xf32> to vector<1x64xf32>
    %c192 = arith.constant 192 : index
    %c0_15 = arith.constant 0 : index
    %30 = vector.load %arg4[%c192, %c0_15] : memref<512x32xf32, #tpu.memory_space<vmem>>, vector<64x32xf32>
    %cst_16 = arith.constant dense<0.000000e+00> : vector<1x32xf32>
    %31 = tpu.matmul %29, %30, %cst_16 {dimension_numbers = #tpu.dot_dimension_numbers<[1], [0], [0], [1], [0, 0, 1, 1], [], []>} : vector<1x64xf32>, vector<64x32xf32>, vector<1x32xf32> -> vector<1x32xf32>
    %32 = arith.addf %28, %31 : vector<1x32xf32>
    %33 = vector.extract_strided_slice %15 {offsets = [4, 0], sizes = [1, 64], strides = [1, 1]} : vector<8x64xf32> to vector<1x64xf32>
    %c256 = arith.constant 256 : index
    %c0_17 = arith.constant 0 : index
    %34 = vector.load %arg4[%c256, %c0_17] : memref<512x32xf32, #tpu.memory_space<vmem>>, vector<64x32xf32>
    %cst_18 = arith.constant dense<0.000000e+00> : vector<1x32xf32>
    %35 = tpu.matmul %33, %34, %cst_18 {dimension_numbers = #tpu.dot_dimension_numbers<[1], [0], [0], [1], [0, 0, 1, 1], [], []>} : vector<1x64xf32>, vector<64x32xf32>, vector<1x32xf32> -> vector<1x32xf32>
    %36 = arith.addf %32, %35 : vector<1x32xf32>
    %37 = vector.extract_strided_slice %15 {offsets = [5, 0], sizes = [1, 64], strides = [1, 1]} : vector<8x64xf32> to vector<1x64xf32>
    %c320 = arith.constant 320 : index
    %c0_19 = arith.constant 0 : index
    %38 = vector.load %arg4[%c320, %c0_19] : memref<512x32xf32, #tpu.memory_space<vmem>>, vector<64x32xf32>
    %cst_20 = arith.constant dense<0.000000e+00> : vector<1x32xf32>
    %39 = tpu.matmul %37, %38, %cst_20 {dimension_numbers = #tpu.dot_dimension_numbers<[1], [0], [0], [1], [0, 0, 1, 1], [], []>} : vector<1x64xf32>, vector<64x32xf32>, vector<1x32xf32> -> vector<1x32xf32>
    %40 = arith.addf %36, %39 : vector<1x32xf32>
    %41 = vector.extract_strided_slice %15 {offsets = [6, 0], sizes = [1, 64], strides = [1, 1]} : vector<8x64xf32> to vector<1x64xf32>
    %c384 = arith.constant 384 : index
    %c0_21 = arith.constant 0 : index
    %42 = vector.load %arg4[%c384, %c0_21] : memref<512x32xf32, #tpu.memory_space<vmem>>, vector<64x32xf32>
    %cst_22 = arith.constant dense<0.000000e+00> : vector<1x32xf32>
    %43 = tpu.matmul %41, %42, %cst_22 {dimension_numbers = #tpu.dot_dimension_numbers<[1], [0], [0], [1], [0, 0, 1, 1], [], []>} : vector<1x64xf32>, vector<64x32xf32>, vector<1x32xf32> -> vector<1x32xf32>
    %44 = arith.addf %40, %43 : vector<1x32xf32>
    %45 = vector.extract_strided_slice %15 {offsets = [7, 0], sizes = [1, 64], strides = [1, 1]} : vector<8x64xf32> to vector<1x64xf32>
    %c448 = arith.constant 448 : index
    %c0_23 = arith.constant 0 : index
    %46 = vector.load %arg4[%c448, %c0_23] : memref<512x32xf32, #tpu.memory_space<vmem>>, vector<64x32xf32>
    %cst_24 = arith.constant dense<0.000000e+00> : vector<1x32xf32>
    %47 = tpu.matmul %45, %46, %cst_24 {dimension_numbers = #tpu.dot_dimension_numbers<[1], [0], [0], [1], [0, 0, 1, 1], [], []>} : vector<1x64xf32>, vector<64x32xf32>, vector<1x32xf32> -> vector<1x32xf32>
    %48 = arith.addf %44, %47 : vector<1x32xf32>
    %c0_25 = arith.constant 0 : index
    %c0_26 = arith.constant 0 : index
    %49 = vector.load %arg5[%c0_25, %c0_26] : memref<1x32xf32, #tpu.memory_space<vmem>>, vector<1x32xf32>
    %50 = arith.addf %48, %49 : vector<1x32xf32>
    %cst_27 = arith.constant 0.000000e+00 : f32
    %51 = vector.broadcast %cst_27 : f32 to vector<1x32xf32>
    %52 = arith.maximumf %50, %51 : vector<1x32xf32>
    %c0_28 = arith.constant 0 : index
    %c0_29 = arith.constant 0 : index
    %53 = vector.load %arg6[%c0_28, %c0_29] : memref<32x3xf32, #tpu.memory_space<vmem>>, vector<32x3xf32>
    %cst_30 = arith.constant dense<0.000000e+00> : vector<1x3xf32>
    %54 = tpu.matmul %52, %53, %cst_30 {dimension_numbers = #tpu.dot_dimension_numbers<[1], [0], [0], [1], [0, 0, 1, 1], [], []>} : vector<1x32xf32>, vector<32x3xf32>, vector<1x3xf32> -> vector<1x3xf32>
    %c0_31 = arith.constant 0 : index
    %c0_32 = arith.constant 0 : index
    %55 = vector.load %arg7[%c0_31, %c0_32] : memref<1x3xf32, #tpu.memory_space<vmem>>, vector<1x3xf32>
    %56 = arith.addf %54, %55 : vector<1x3xf32>
    %c0_33 = arith.constant 0 : index
    %c0_34 = arith.constant 0 : index
    %c0_35 = arith.constant 0 : index
    %57 = vector.load %arg8[%c0_33, %c0_34, %c0_35] : memref<1x1x3xf32, #tpu.memory_space<vmem>>, vector<1x1x3xf32>
    %58 = vector.shape_cast %57 : vector<1x1x3xf32> to vector<1x3xf32>
    %59 = vector.shape_cast %56 : vector<1x3xf32> to vector<1x1x3xf32>
    tpu.vector_store %arg8[%c0_33, %c0_34, %c0_35], %59 {strides = array<i32>} : memref<1x1x3xf32, #tpu.memory_space<vmem>>, vector<1x1x3xf32>,
    return
  }
  func.func @transform_0(%arg0: i32) -> (i32, i32, i32) {
    %c0_i32 = arith.constant 0 : i32
    %c0_i32_0 = arith.constant 0 : i32
    %c0_i32_1 = arith.constant 0 : i32
    return %arg0, %c0_i32, %c0_i32_0 : i32, i32, i32
  }
  func.func @transform_1(%arg0: i32) -> (i32, i32) {
    %c0_i32 = arith.constant 0 : i32
    %c0_i32_0 = arith.constant 0 : i32
    %c0_i32_1 = arith.constant 0 : i32
    return %c0_i32, %c0_i32_0 : i32, i32
  }
  func.func @transform_2(%arg0: i32) -> (i32, i32) {
    %c0_i32 = arith.constant 0 : i32
    %c0_i32_0 = arith.constant 0 : i32
    %c0_i32_1 = arith.constant 0 : i32
    return %c0_i32, %c0_i32_0 : i32, i32
  }
  func.func @transform_3(%arg0: i32) -> (i32, i32) {
    %c0_i32 = arith.constant 0 : i32
    %c0_i32_0 = arith.constant 0 : i32
    %c0_i32_1 = arith.constant 0 : i32
    return %c0_i32, %c0_i32_0 : i32, i32
  }
  func.func @transform_4(%arg0: i32) -> (i32, i32) {
    %c0_i32 = arith.constant 0 : i32
    %c0_i32_0 = arith.constant 0 : i32
    %c0_i32_1 = arith.constant 0 : i32
    return %c0_i32, %c0_i32_0 : i32, i32
  }
  func.func @transform_5(%arg0: i32) -> (i32, i32) {
    %c0_i32 = arith.constant 0 : i32
    %c0_i32_0 = arith.constant 0 : i32
    %c0_i32_1 = arith.constant 0 : i32
    return %c0_i32, %c0_i32_0 : i32, i32
  }
  func.func @transform_6(%arg0: i32) -> (i32, i32) {
    %c0_i32 = arith.constant 0 : i32
    %c0_i32_0 = arith.constant 0 : i32
    %c0_i32_1 = arith.constant 0 : i32
    return %c0_i32, %c0_i32_0 : i32, i32
  }
  func.func @transform_7(%arg0: i32) -> (i32, i32, i32) {
    %c0_i32 = arith.constant 0 : i32
    %c0_i32_0 = arith.constant 0 : i32
    %c0_i32_1 = arith.constant 0 : i32
    return %arg0, %c0_i32, %c0_i32_0 : i32, i32, i32
  }
}

</mosaic_0001>

<bundles_post_ra>
// kernel: enc_n_down_forward.1
= control target key start
LH: loop header
LB: loop body
LE: loop exit
PB: predicated region body
PF: predicated region fallthrough
CT: control target
= control target key end

     0   :  { %12 = vsyncpa [#allocation3], 0  ;;  %s2021_s0 = inlined_call_operand.vmem [shape: f32[2,36,256], index: 0, kind: input, shape index: {}]   ;;  %s2022_s1 = inlined_call_operand.vmem [shape: f32[8,36], index: 1, kind: input, shape index: {}]   ;;  %s2023_s2 = inlined_call_operand.vmem [shape: f32[8,1], index: 2, kind: input, shape index: {}]   ;;  %s2024_s3 = inlined_call_operand.vmem [shape: f32[512,32], index: 3, kind: input, shape index: {}]   ;;  %s2025_s4 = inlined_call_operand.vmem [shape: f32[1,32], index: 4, kind: input, shape index: {}]   ;;  %s2026_s5 = inlined_call_operand.vmem [shape: f32[32,3], index: 5, kind: input, shape index: {}]   ;;  %s2027_s6 = inlined_call_operand.vmem [shape: f32[1,3], index: 6, kind: input, shape index: {}]   ;;  %s2028_s7 = inlined_call_operand.hbm [shape: f32[2,1,3], index: 7, kind: output, shape index: {}]  }
   0x1   :  { %14 = vsyncpa [#allocation3 + $0x1], 0  ;;  %s1607_s24 = smov 0   ;;  %s1609_s25 = smov 0  }
   0x2   :  { %s1611_s26 = smov 0   ;;  %s1613_s27 = smov 0  }
   0x3 LB: > { %s1628_s28 = sadd.s32 4294967295, %s1560_s27   ;;  %s1195_s29 = sadd.s32 4294967294, %s1560_s27   ;;  %s1560_s27 = sphi %s1613_s27, %s2034_s27   ;;  %s1556_s26 = sphi %s1611_s26, %s2033_s26   ;;  %s1552_s25 = sphi %s1609_s25, %s2032_s25   ;;  %s1548_s24 = sphi %s1607_s24, %s2031_s24  }
   0x4   : > { %s1632_s30 = sadd.s32 1, %s1560_s27   ;;  %s179_s8 = sadd.s32 1, %s1556_s26 }
   0x5   : > { %s176_s9 = ssub.s32 %s1560_s27, %s1632_s30  ;;  %p189_p0 = scmp.ne.s32.totalorder %s1556_s26, %s1552_s25 }
   0x6   : > { %p177_p1 = scmp.eq.s32.totalorder %s176_s9, 0  ;;  %p190_p2 = scmp.eq.s32.totalorder %s1628_s28, 1 }
   0x7   : > { %p195_p3 = scmp.ne.s32.totalorder %s1552_s25, %s1548_s24  ;;  %p196_p4 = scmp.eq.s32.totalorder %s1195_s29, 1 }
   0x8   : > { %s1643_s10 = scalar_select %p177_p1, %s1556_s26, %s179_s8  }
   0x9   : > { %p1645_p5 = por %p190_p2, %p189_p0  ;;  %p1649_p6 = por %p196_p4, %p195_p3 }
   0xa   : > { %p1198_p7 = scmp.ge.s32.totalorder %s1560_s27, 1  ;;  %p240_p8 = scmp.lt.s32.totalorder %s1560_s27, 3 }
   0xc   : > { %p241_p9 = pnand %p1198_p7, %p240_p8 }
   0xd   : > { %p271_p10 = scmp.lt.s32.totalorder (!%p241_p9), %s1628_s28, 1  ;;  %s1565_s9 = smov (!%p241_p9), 64  }
   0xe   : > { %244 = sbr.rel (%p241_p9) target bundleno = 816 (0x330), region = 48  ;;  %s269_s21 = sand.u32 (!%p241_p9), 1, %s1552_s25  }
   0xf   : > { %s1212_s29 = sshll.u32 (!%p241_p9), %s1628_s28, 4  ;;  %s270_s8 = scalar_lea.vmem (!%p241_p9), [#allocation2], %s269_s21 }
  0x13   : > { %v1562_v0 = vmov 0.0   ;;  %v1563_v1 = vmov 0   ;;  %v287_v2 = vld [vmem:[%s2023_s2] sm:$0xff]  ;;  %s272_s15 = scalar_select %p271_p10, %s1628_s28, 1  ;;  %vm297_vm0 = vcmask 1043456   ;;  %vm293_vm1 = vcmask 293888  }
  0x14   : > { %368 = vmatprep.mubr.f32.mxu0 %v1562_v0  ;;  %1499 = vset.pattern.permute.xlu0 %v1563_v1  ;;  %v276_v13 = vld [vmem:[%s2022_s1] sm:$0xff]  ;;  %v395_v14 = vld [vmem:[%s2024_s3 + $0x38] sm:$0xff]  ;;  %v394_v16 = vld [vmem:[%s2024_s3 + $0x30] sm:$0xff]  ;;  %vm1564_vm2 = vmmov 0   ;;  %vm406_vm3 = vcmask 523264   ;;  %vm1051_vm4 = vcmask 261120  }
  0x15   : > { %290 = vperm.xlu0 %1499, %v287_v2   ;;  %1292 = vmatprep.subr.mxu1 %v1562_v0  ;;  %s1455_s16 = smul.u32 80, %s272_s15  ;;  %v403_v15 = vld [vmem:[%s2024_s3 + $0x78] sm:$0xff]  ;;  %v402_v17 = vld [vmem:[%s2024_s3 + $0x70] sm:$0xff]  ;;  %v393_v18 = vld [vmem:[%s2024_s3 + $0x28] sm:$0xff]  ;;  %vm1125_vm5 = vcmask 16384   ;;  %s1986_s15 = scalar_lea.hbm %s2028_s7, %s1212_s29 }
  0x16   : > { %1293 = vmatpush3.msra.mxu1 %v403_v15  ;;  %v401_v19 = vld [vmem:[%s2024_s3 + $0x68] sm:$0xff]  ;;  %v392_v20 = vld [vmem:[%s2024_s3 + $0x20] sm:$0xff]  ;;  %v391_v22 = vld [vmem:[%s2024_s3 + $0x18] sm:$0xff]  ;;  %1308 = vmatprep.mubr.msk.f32.mxu1 %vm1564_vm2, %v1562_v0  ;;  %s1566_s28 = smov [#allocation2]  }
  0x17   : > { %s275_s19 = scalar_lea.vmem %s2021_s0, %s1455_s16  ;;  %1294 = vmatprep.subr.mxu1 %v1562_v0  ;;  %v400_v21 = vld [vmem:[%s2024_s3 + $0x60] sm:$0xff]  ;;  %v399_v23 = vld [vmem:[%s2024_s3 + $0x58] sm:$0xff]  ;;  %v390_v24 = vld [vmem:[%s2024_s3 + $0x10] sm:$0xff]  ;;  %s1128_s16 = scalar_lea.sflag [#allocation3], %s269_s21 }
  0x18   : > { %v286_v3 = vld [vmem:[%s275_s19 + $0x48] sm:$0xf]  ;;  %v285_v4 = vld [vmem:[%s275_s19 + $0x40] sm:$0xf]  ;;  %v284_v5 = vld [vmem:[%s275_s19 + $0x38] sm:$0xff]  ;;  %1295 = vmatpush3.msra.mxu1 %v402_v17  ;;  %s1504_s18 = sshll.u32 %s1566_s28, 4  ;;  %s1505_s18 = int_to_ptr.vmem [resolvable:$false] %s1504_s18 }
  0x19   : > { %1200 = vmatprep.subr.msk.mxu0 %vm297_vm0, %v286_v3  ;;  %v283_v6 = vld [vmem:[%s275_s19 + $0x30] sm:$0xff]  ;;  %v282_v7 = vld [vmem:[%s275_s19 + $0x28] sm:$0xff]  ;;  %v281_v8 = vld [vmem:[%s275_s19 + $0x20] sm:$0xff]  ;;  %1296 = vmatprep.subr.mxu1 %v1562_v0 }
  0x1a   : > { %1201 = vmatpush1.msk.msra.mxu0 %vm297_vm0, %v285_v4  ;;  %v280_v9 = vld [vmem:[%s275_s19 + $0x18] sm:$0xff]  ;;  %v279_v10 = vld [vmem:[%s275_s19 + $0x10] sm:$0xff]  ;;  %v278_v11 = vld [vmem:[%s275_s19 + $0x8] sm:$0xff]  ;;  %1297 = vmatpush3.msra.mxu1 %v401_v19 }
  0x1b   : > { %328 = vmatprep.subr.mxu0 %v284_v5  ;;  %v277_v12 = vld [vmem:[%s275_s19] sm:$0xff]  ;;  %1298 = vmatprep.subr.mxu1 %v1562_v0  ;;  %v398_v25 = vld [vmem:[%s2024_s3 + $0x50] sm:$0xff]  ;;  %v389_v26 = vld [vmem:[%s2024_s3 + $0x8] sm:$0xff]  ;;  %s1506_s19 = scalar_lea.vmem %s1505_s18, 32 }
  0x1c   : > { %329 = vmatpush1.msra.mxu0 %v283_v6  ;;  %1299 = vmatpush3.msra.mxu1 %v400_v21  ;;  %v397_v27 = vld [vmem:[%s2024_s3 + $0x48] sm:$0xff]  ;;  %v388_v28 = vld [vmem:[%s2024_s3] sm:$0xff]  ;;  %v640_v42 = vld [vmem:[%s2024_s3 + $0xf8] sm:$0xff] }
  0x1d   : > { %330 = vmatprep.subr.mxu0 %v282_v7  ;;  %1300 = vmatprep.subr.mxu1 %v1562_v0  ;;  %v396_v29 = vld [vmem:[%s2024_s3 + $0x40] sm:$0xff]  ;;  %v558_v44 = vld [vmem:[%s2024_s3 + $0xb8] sm:$0xff]  ;;  %v639_v45 = vld [vmem:[%s2024_s3 + $0xf0] sm:$0xff] }
  0x1e   : > { %331 = vmatpush1.msra.mxu0 %v281_v8  ;;  %1301 = vmatpush3.msra.mxu1 %v399_v23  ;;  %v557_v46 = vld [vmem:[%s2024_s3 + $0xb0] sm:$0xff]  ;;  %v638_v47 = vld [vmem:[%s2024_s3 + $0xe8] sm:$0xff]  ;;  %v637_v49 = vld [vmem:[%s2024_s3 + $0xe0] sm:$0xff] }
  0x1f   : > { %332 = vmatprep.subr.mxu0 %v280_v9  ;;  %1302 = vmatprep.subr.mxu1 %v1562_v0  ;;  %v556_v48 = vld [vmem:[%s2024_s3 + $0xa8] sm:$0xff]  ;;  %v555_v50 = vld [vmem:[%s2024_s3 + $0xa0] sm:$0xff]  ;;  %v636_v51 = vld [vmem:[%s2024_s3 + $0xd8] sm:$0xff] }
  0x20   : > { %333 = vmatpush1.msra.mxu0 %v279_v10  ;;  %1303 = vmatpush3.msra.mxu1 %v398_v25  ;;  %v554_v52 = vld [vmem:[%s2024_s3 + $0x98] sm:$0xff]  ;;  %v635_v53 = vld [vmem:[%s2024_s3 + $0xd0] sm:$0xff]  ;;  %v634_v55 = vld [vmem:[%s2024_s3 + $0xc8] sm:$0xff] }
  0x21   : > { %334 = vmatprep.subr.mxu0 %v278_v11  ;;  %1304 = vmatprep.subr.mxu1 %v1562_v0  ;;  %v553_v54 = vld [vmem:[%s2024_s3 + $0x90] sm:$0xff]  ;;  %v552_v56 = vld [vmem:[%s2024_s3 + $0x88] sm:$0xff]  ;;  %v633_v57 = vld [vmem:[%s2024_s3 + $0xc0] sm:$0xff] }
  0x22   : > { %335 = vmatpush1.msra.mxu0 %v277_v12  ;;  %1305 = vmatpush3.msra.mxu1 %v397_v27  ;;  %v551_v59 = vld [vmem:[%s2024_s3 + $0x80] sm:$0xff]  ;;  %v804_v60 = vld [vmem:[%s2024_s3 + $0x178] sm:$0xff]  ;;  %v803_v63 = vld [vmem:[%s2024_s3 + $0x170] sm:$0xff] }
  0x23   : > { %1202 = vmatmul.mubr.msk.f32.vlgmr.msra.gmra.mxu0 %vm293_vm1, %v276_v13  ;;  %1311 = vmatprep.subr.mxu0 %v1562_v0  ;;  %v722_v62 = vld [vmem:[%s2024_s3 + $0x138] sm:$0xff]  ;;  %v721_v1 = vld [vmem:[%s2024_s3 + $0x130] sm:$0xff]  ;;  %v802_v2 = vld [vmem:[%s2024_s3 + $0x168] sm:$0xff] }
  0x24   : > { %1312 = vmatpush3.msra.mxu0 %v395_v14  ;;  %1306 = vmatprep.subr.mxu1 %v1562_v0  ;;  %v720_v3 = vld [vmem:[%s2024_s3 + $0x128] sm:$0xff]  ;;  %v801_v4 = vld [vmem:[%s2024_s3 + $0x160] sm:$0xff]  ;;  %v800_v6 = vld [vmem:[%s2024_s3 + $0x158] sm:$0xff] }
  0x25   : > { %1313 = vmatprep.subr.mxu0 %v1562_v0  ;;  %1327 = vmatprep.mubr.msk.f32.mxu0 %vm1564_vm2, %v1562_v0  ;;  %v719_v5 = vld [vmem:[%s2024_s3 + $0x120] sm:$0xff]  ;;  %v718_v7 = vld [vmem:[%s2024_s3 + $0x118] sm:$0xff]  ;;  %v799_v8 = vld [vmem:[%s2024_s3 + $0x150] sm:$0xff] }
  0x26   : > { %1314 = vmatpush3.msra.mxu0 %v394_v16  ;;  %1307 = vmatpush3.msra.mxu1 %v396_v29  ;;  %v717_v9 = vld [vmem:[%s2024_s3 + $0x110] sm:$0xff]  ;;  %v798_v10 = vld [vmem:[%s2024_s3 + $0x148] sm:$0xff]  ;;  %v797_v12 = vld [vmem:[%s2024_s3 + $0x140] sm:$0xff] }
  0x27   : > { %1315 = vmatprep.subr.mxu0 %v1562_v0  ;;  %1330 = vmatprep.subr.mxu1 %v1562_v0  ;;  %v716_v11 = vld [vmem:[%s2024_s3 + $0x108] sm:$0xff]  ;;  %v715_v14 = vld [vmem:[%s2024_s3 + $0x100] sm:$0xff]  ;;  %v968_v15 = vld [vmem:[%s2024_s3 + $0x1f8] sm:$0xff] }
  0x28   : > { %1316 = vmatpush3.msra.mxu0 %v393_v18  ;;  %v886_v17 = vld [vmem:[%s2024_s3 + $0x1b8] sm:$0xff]  ;;  %v967_v18 = vld [vmem:[%s2024_s3 + $0x1f0] sm:$0xff]  ;;  %v884_v21 = vld [vmem:[%s2024_s3 + $0x1a8] sm:$0xff] }
  0x29   : > { %1317 = vmatprep.subr.mxu0 %v1562_v0  ;;  %v885_v19 = vld [vmem:[%s2024_s3 + $0x1b0] sm:$0xff]  ;;  %v883_v23 = vld [vmem:[%s2024_s3 + $0x1a0] sm:$0xff]  ;;  %v882_v25 = vld [vmem:[%s2024_s3 + $0x198] sm:$0xff] }
  0x2a   : > { %1318 = vmatpush3.msra.mxu0 %v392_v20  ;;  %v966_v20 = vld [vmem:[%s2024_s3 + $0x1e8] sm:$0xff]  ;;  %v881_v27 = vld [vmem:[%s2024_s3 + $0x190] sm:$0xff] }
  0x2b   : > { %1319 = vmatprep.subr.mxu0 %v1562_v0  ;;  %v880_v29 = vld [vmem:[%s2024_s3 + $0x188] sm:$0xff] }
  0x2c   : > { %1320 = vmatpush3.msra.mxu0 %v391_v22  ;;  %v965_v22 = vld [vmem:[%s2024_s3 + $0x1e0] sm:$0xff] }
  0x2d   : > { %1321 = vmatprep.subr.mxu0 %v1562_v0 }
  0x2e   : > { %1322 = vmatpush3.msra.mxu0 %v390_v24  ;;  %v964_v24 = vld [vmem:[%s2024_s3 + $0x1d8] sm:$0xff] }
  0x2f   : > { %1323 = vmatprep.subr.mxu0 %v1562_v0 }
  0x30   : > { %1324 = vmatpush3.msra.mxu0 %v389_v26  ;;  %v963_v26 = vld [vmem:[%s2024_s3 + $0x1d0] sm:$0xff] }
  0x31   : > { %1325 = vmatprep.subr.mxu0 %v1562_v0 }
  0x32   : > { %1326 = vmatpush3.msra.mxu0 %v388_v28  ;;  %v962_v28 = vld [vmem:[%s2024_s3 + $0x1c8] sm:$0xff] }
  0x33   : > { %1349 = vmatprep.subr.mxu0 %v1562_v0 }
  0x90   : > { %v291_v30 = vpop.permute.xlu0 %290 }
  0xe3   : > { %v370_v31 = vpop.f32.mrf.mxu0 }
  0xe4   : > { %v371_v32 = vadd.f32 %v370_v31, %v291_v30 }
  0xe5   : > { %v372_v33 = vpop.f32.mrf.mxu0 }
  0xe6   : > { %v375_v34 = vmax.f32 %v371_v32, 0.0  ;;  %v373_v35 = vadd.f32 %v372_v33, %v291_v30  ;;  %v961_v30 = vld [vmem:[%s2024_s3 + $0x1c0] sm:$0xff] }
  0xe7   : > { %v879_v32 = vld [vmem:[%s2024_s3 + $0x180] sm:$0xff] }
  0xe8   : > { %v376_v36 = vmax.f32 %v373_v35, 0.0  ;;  %378 = vrot.lane.b32.xlu0 %v375_v34, %s1565_s9  ;;  %v1048_v35 = vld [vmem:[%s2026_s5 + $0x10] sm:$0xff] }
  0xea   : > { %383 = vrot.lane.b32.xlu1 %v376_v36, %s1565_s9  ;;  %s1140_s9 = sshll.u32 %s270_s8, 4  ;;  %s1141_s9 = int_to_ptr.vmem [resolvable:$true] %s1140_s9 }
  0xeb   : > { %s1500_s17 = scalar_lea.vmem %s1141_s9, 16  ;;  %p1507_p0 = scmp.lt.s32.totalorder %s1141_s9, %s1505_s18 }
  0xec   : > { %p1501_p11 = scmp.ne.s32.totalorder %s1141_s9, %s1500_s17  ;;  %p1508_p1 = scmp.lt.s32.totalorder %s1506_s19, %s1500_s17 }
  0xee   : > { %p1502_p12 = pnand %p1501_p11, %p1645_p5  ;;  %p1509_p2 = por %p1508_p1, %p1507_p0 }
  0xf0   : > { %p1503_p13 = pneg %p1502_p12 }
  0xf2   : > { %p1510_p3 = pnand %p1509_p2, %p1503_p13 }
 0x15a   : > { %v379_v37 = vpop.permute.xlu0 %378 }
 0x15b   : > { %v381_v39 = vmax.f32 %v375_v34, %v379_v37  ;;  %v1049_v34 = vld [vmem:[%s2026_s5 + $0x18] sm:$0xff]  ;;  %v1046_v37 = vld [vmem:[%s2026_s5] sm:$0xff] }
 0x15c   : > { %v384_v38 = vpop.permute.xlu1 %383 }
 0x15d   : > { %v386_v40 = vmax.f32 %v376_v36, %v384_v38  ;;  %v1047_v36 = vld [vmem:[%s2026_s5 + $0x8] sm:$0xff] }
 0x15f   : > { %v1737_v41 = vmax.f32 %v381_v39, %v386_v40 }
 0x161   : > { %1328 = vmatmul.mubr.msk.f32.vlgmr.msra.gmra.mxu0 %vm406_vm3, %v1737_v41  ;;  %v405_v43 = vrot.slane %v1737_v41, 1  ;;  %v641_v58 = vrot.slane %v1737_v41, 3  ;;  %v559_v61 = vrot.slane %v1737_v41, 2  ;;  %v805_v13 = vrot.slane %v1737_v41, 5 }
 0x162   : > { %1350 = vmatpush3.msra.mxu0 %v640_v42  ;;  %1365 = vmatprep.mubr.msk.f32.mxu0 %vm1564_vm2, %v1562_v0  ;;  %v723_v16 = vrot.slane %v1737_v41, 4  ;;  %v969_v31 = vrot.slane %v1737_v41, 7  ;;  %v887_v33 = vrot.slane %v1737_v41, 6 }
 0x163   : > { %1351 = vmatprep.subr.mxu0 %v1562_v0  ;;  %1309 = vmatmul.mubr.msk.f32.vlgmr.msra.gmra.mxu1 %vm406_vm3, %v405_v43 }
 0x164   : > { %1331 = vmatpush3.msra.mxu1 %v558_v44  ;;  %1352 = vmatpush3.msra.mxu0 %v639_v45 }
 0x165   : > { %1332 = vmatprep.subr.mxu1 %v1562_v0  ;;  %1353 = vmatprep.subr.mxu0 %v1562_v0 }
 0x166   : > { %1333 = vmatpush3.msra.mxu1 %v557_v46  ;;  %1354 = vmatpush3.msra.mxu0 %v638_v47 }
 0x167   : > { %1334 = vmatprep.subr.mxu1 %v1562_v0  ;;  %1355 = vmatprep.subr.mxu0 %v1562_v0 }
 0x168   : > { %1335 = vmatpush3.msra.mxu1 %v556_v48  ;;  %1356 = vmatpush3.msra.mxu0 %v637_v49 }
 0x169   : > { %1336 = vmatprep.subr.mxu1 %v1562_v0  ;;  %1357 = vmatprep.subr.mxu0 %v1562_v0 }
 0x16a   : > { %1337 = vmatpush3.msra.mxu1 %v555_v50  ;;  %1358 = vmatpush3.msra.mxu0 %v636_v51 }
 0x16b   : > { %1338 = vmatprep.subr.mxu1 %v1562_v0  ;;  %1359 = vmatprep.subr.mxu0 %v1562_v0 }
 0x16c   : > { %1339 = vmatpush3.msra.mxu1 %v554_v52  ;;  %1360 = vmatpush3.msra.mxu0 %v635_v53 }
 0x16d   : > { %1340 = vmatprep.subr.mxu1 %v1562_v0  ;;  %1361 = vmatprep.subr.mxu0 %v1562_v0 }
 0x16e   : > { %1341 = vmatpush3.msra.mxu1 %v553_v54  ;;  %1362 = vmatpush3.msra.mxu0 %v634_v55 }
 0x16f   : > { %1342 = vmatprep.subr.mxu1 %v1562_v0  ;;  %1363 = vmatprep.subr.mxu0 %v1562_v0 }
 0x170   : > { %1343 = vmatpush3.msra.mxu1 %v552_v56  ;;  %1364 = vmatpush3.msra.mxu0 %v633_v57 }
 0x171   : > { %1344 = vmatprep.subr.mxu1 %v1562_v0  ;;  %1366 = vmatmul.mubr.msk.f32.vlgmr.msra.gmra.mxu0 %vm406_vm3, %v641_v58  ;;  %v1043_v58 = vld [vmem:[%s2025_s4] sm:$0x1] }
 0x172   : > { %1387 = vmatprep.subr.mxu0 %v1562_v0  ;;  %1345 = vmatpush3.msra.mxu1 %v551_v59 }
 0x173   : > { %1346 = vmatprep.mubr.msk.f32.mxu1 %vm1564_vm2, %v1562_v0  ;;  %1388 = vmatpush3.msra.mxu0 %v804_v60 }
 0x174   : > { %1347 = vmatmul.mubr.msk.f32.vlgmr.msra.gmra.mxu1 %vm406_vm3, %v559_v61  ;;  %1368 = vmatprep.subr.mxu1 %v1562_v0 }
 0x175   : > { %1389 = vmatprep.subr.mxu0 %v1562_v0  ;;  %1369 = vmatpush3.msra.mxu1 %v722_v62 }
 0x176   : > { %1390 = vmatpush3.msra.mxu0 %v803_v63  ;;  %1370 = vmatprep.subr.mxu1 %v1562_v0  ;;  %v1050_v63 = vld [vmem:[%s2027_s6] sm:$0x1] }
 0x177   : > { %1391 = vmatprep.subr.mxu0 %v1562_v0  ;;  %1371 = vmatpush3.msra.mxu1 %v721_v1 }
 0x178   : > { %1392 = vmatpush3.msra.mxu0 %v802_v2  ;;  %1372 = vmatprep.subr.mxu1 %v1562_v0 }
 0x179   : > { %1393 = vmatprep.subr.mxu0 %v1562_v0  ;;  %1373 = vmatpush3.msra.mxu1 %v720_v3 }
 0x17a   : > { %1394 = vmatpush3.msra.mxu0 %v801_v4  ;;  %1374 = vmatprep.subr.mxu1 %v1562_v0 }
 0x17b   : > { %1395 = vmatprep.subr.mxu0 %v1562_v0  ;;  %1375 = vmatpush3.msra.mxu1 %v719_v5 }
 0x17c   : > { %1396 = vmatpush3.msra.mxu0 %v800_v6  ;;  %1376 = vmatprep.subr.mxu1 %v1562_v0 }
 0x17d   : > { %1397 = vmatprep.subr.mxu0 %v1562_v0  ;;  %1377 = vmatpush3.msra.mxu1 %v718_v7 }
 0x17e   : > { %1398 = vmatpush3.msra.mxu0 %v799_v8  ;;  %1378 = vmatprep.subr.mxu1 %v1562_v0 }
 0x17f   : > { %1399 = vmatprep.subr.mxu0 %v1562_v0  ;;  %1379 = vmatpush3.msra.mxu1 %v717_v9 }
 0x180   : > { %1400 = vmatpush3.msra.mxu0 %v798_v10  ;;  %1380 = vmatprep.subr.mxu1 %v1562_v0 }
 0x181   : > { %1401 = vmatprep.subr.mxu0 %v1562_v0  ;;  %1381 = vmatpush3.msra.mxu1 %v716_v11 }
 0x182   : > { %1402 = vmatpush3.msra.mxu0 %v797_v12  ;;  %1403 = vmatprep.mubr.msk.f32.mxu0 %vm1564_vm2, %v1562_v0 }
 0x183   : > { %1382 = vmatprep.subr.mxu1 %v1562_v0  ;;  %1404 = vmatmul.mubr.msk.f32.vlgmr.msra.gmra.mxu0 %vm406_vm3, %v805_v13 }
 0x184   : > { %1425 = vmatprep.subr.mxu0 %v1562_v0  ;;  %1383 = vmatpush3.msra.mxu1 %v715_v14 }
 0x185   : > { %1384 = vmatprep.mubr.msk.f32.mxu1 %vm1564_vm2, %v1562_v0  ;;  %1426 = vmatpush3.msra.mxu0 %v968_v15 }
 0x186   : > { %1385 = vmatmul.mubr.msk.f32.vlgmr.msra.gmra.mxu1 %vm406_vm3, %v723_v16  ;;  %1406 = vmatprep.subr.mxu1 %v1562_v0 }
 0x187   : > { %1427 = vmatprep.subr.mxu0 %v1562_v0  ;;  %1407 = vmatpush3.msra.mxu1 %v886_v17 }
 0x188   : > { %1428 = vmatpush3.msra.mxu0 %v967_v18  ;;  %1408 = vmatprep.subr.mxu1 %v1562_v0 }
 0x189   : > { %1429 = vmatprep.subr.mxu0 %v1562_v0  ;;  %1409 = vmatpush3.msra.mxu1 %v885_v19 }
 0x18a   : > { %1430 = vmatpush3.msra.mxu0 %v966_v20  ;;  %1410 = vmatprep.subr.mxu1 %v1562_v0 }
 0x18b   : > { %1431 = vmatprep.subr.mxu0 %v1562_v0  ;;  %1411 = vmatpush3.msra.mxu1 %v884_v21 }
 0x18c   : > { %1432 = vmatpush3.msra.mxu0 %v965_v22  ;;  %1412 = vmatprep.subr.mxu1 %v1562_v0 }
 0x18d   : > { %1433 = vmatprep.subr.mxu0 %v1562_v0  ;;  %1413 = vmatpush3.msra.mxu1 %v883_v23 }
 0x18e   : > { %1434 = vmatpush3.msra.mxu0 %v964_v24  ;;  %1414 = vmatprep.subr.mxu1 %v1562_v0 }
 0x18f   : > { %1435 = vmatprep.subr.mxu0 %v1562_v0  ;;  %1415 = vmatpush3.msra.mxu1 %v882_v25 }
 0x190   : > { %1436 = vmatpush3.msra.mxu0 %v963_v26  ;;  %1416 = vmatprep.subr.mxu1 %v1562_v0 }
 0x191   : > { %1437 = vmatprep.subr.mxu0 %v1562_v0  ;;  %1417 = vmatpush3.msra.mxu1 %v881_v27 }
 0x192   : > { %1438 = vmatpush3.msra.mxu0 %v962_v28  ;;  %1418 = vmatprep.subr.mxu1 %v1562_v0 }
 0x193   : > { %1439 = vmatprep.subr.mxu0 %v1562_v0  ;;  %1419 = vmatpush3.msra.mxu1 %v880_v29 }
 0x194   : > { %1440 = vmatpush3.msra.mxu0 %v961_v30  ;;  %1441 = vmatprep.mubr.msk.f32.mxu0 %vm1564_vm2, %v1562_v0 }
 0x195   : > { %1420 = vmatprep.subr.mxu1 %v1562_v0  ;;  %1442 = vmatmul.mubr.msk.f32.vlgmr.msra.gmra.mxu0 %vm406_vm3, %v969_v31 }
 0x196   : > { %1421 = vmatpush3.msra.mxu1 %v879_v32  ;;  %1422 = vmatprep.mubr.msk.f32.mxu1 %vm1564_vm2, %v1562_v0 }
 0x197   : > { %1423 = vmatmul.mubr.msk.f32.vlgmr.msra.gmra.mxu1 %vm406_vm3, %v887_v33  ;;  %1444 = vmatprep.subr.mxu1 %v1562_v0 }
 0x198   : > { %1452 = vmatprep.mubr.msk.f32.mxu1 %vm1564_vm2, %v1562_v0  ;;  %1445 = vmatpush3.msra.mxu1 %v1049_v34 }
 0x199   : > { %1446 = vmatprep.subr.mxu1 %v1562_v0 }
 0x19a   : > { %1447 = vmatpush3.msra.mxu1 %v1048_v35 }
 0x19b   : > { %1448 = vmatprep.subr.mxu1 %v1562_v0 }
 0x19c   : > { %1449 = vmatpush3.msra.mxu1 %v1047_v36 }
 0x19d   : > { %1450 = vmatprep.subr.mxu1 %v1562_v0 }
 0x19e   : > { %1451 = vmatpush3.msra.mxu1 %v1046_v37 }
 0x221   : > { %v547_v38 = vpop.f32.mrf.mxu0 }
 0x223   : > { %v475_v39 = vpop.f32.mrf.mxu1  ;;  %v1329_v40 = vpop.f32.mrf.mxu0 }
 0x224   : > { %v548_v50 = vadd.f32 %v547_v38, %v475_v39 }
 0x225   : > { %v1310_v41 = vpop.f32.mrf.mxu1 }
 0x231   : > { %v710_v42 = vpop.f32.mrf.mxu0 }
 0x233   : > { %v1367_v43 = vpop.f32.mrf.mxu0 }
 0x234   : > { %v628_v44 = vpop.f32.mrf.mxu1 }
 0x235   : > { %v632_v0 = vadd.f32 %v628_v44, %v548_v50 }
 0x236   : > { %v1348_v45 = vpop.f32.mrf.mxu1 }
 0x237   : > { %v714_v51 = vadd.f32 %v710_v42, %v632_v0 }
 0x243   : > { %v874_v46 = vpop.f32.mrf.mxu0 }
 0x245   : > { %v1405_v47 = vpop.f32.mrf.mxu0 }
 0x246   : > { %v792_v48 = vpop.f32.mrf.mxu1 }
 0x247   : > { %v796_v52 = vadd.f32 %v792_v48, %v714_v51 }
 0x248   : > { %v1386_v49 = vpop.f32.mrf.mxu1 }
 0x249   : > { %v878_v54 = vadd.f32 %v874_v46, %v796_v52 }
 0x255   : > { %v1038_v53 = vpop.f32.mrf.mxu0 }
 0x257   : > { %v956_v55 = vpop.f32.mrf.mxu1  ;;  %v1443_v56 = vpop.f32.mrf.mxu0 }
 0x258   : > { %v960_v57 = vadd.f32 %v956_v55, %v878_v54 }
 0x259   : > { %v1424_v59 = vpop.f32.mrf.mxu1 }
 0x25a   : > { %v1042_v60 = vadd.f32 %v1038_v53, %v960_v57 }
 0x25c   : > { %v1044_v61 = vadd.f32 %v1043_v58, %v1042_v60 }
 0x25e   : > { %v1045_v62 = vmax.f32 %v1044_v61, 0.0 }
 0x260   : > { %1453 = vmatmul.mubr.msk.f32.vlgmr.msra.gmra.mxu1 %vm1051_vm4, %v1045_v62 }
 0x320   : > { %v1121_v1 = vpop.f32.mrf.mxu1 }
 0x321   : > { %v1122_v2 = vadd.f32 %v1121_v1, %v1050_v63 }
 0x322   : > { %v1454_v3 = vpop.f32.mrf.mxu1 }
 0x323   : > { %1126 = vst.msk [vmem:[%s270_s8] sm:$0x1] %vm1125_vm5, %v1122_v2 }
 0x324   : > { %1513 = shalt.err (!%p1510_p3)
}
 0x325   : > { %s1514_s20 = scalar_lea.hbm %s1986_s15, 16  ;;  %s1518_s23 = scalar_lea.hbm %s2028_s7, 32 }
 0x326   : > { %p1515_p4 = scmp.ne.s32.totalorder %s1986_s15, %s1514_s20  ;;  %p1519_p9 = scmp.lt.s32.totalorder %s1986_s15, %s2028_s7 }
 0x327   : > { %p1520_p10 = scmp.lt.s32.totalorder %s1518_s23, %s1514_s20 }
 0x328   : > { %p1516_p7 = pnand %p1515_p4, %p1645_p5 }
 0x329   : > { %p1521_p11 = por %p1520_p10, %p1519_p9 }
 0x32a   : > { %p1517_p8 = pneg %p1516_p7 }
 0x32c   : > { %p1522_p12 = pnand %p1521_p11, %p1517_p8 }
 0x32e   : > { %1525 = shalt.err (!%p1522_p12)
}
 0x32f   : > { %1456 = dma.vmem_to_hbm [thread:$0]  (%p1645_p5), %s1141_s9, 16, %s1986_s15, %s1128_s16  }
 0x330 PF: > { %p1462_p13 = scmp.ge.s32.totalorder %s1560_s27, 2  ;;  %s1152_s13 = sand.u32 1, %s1548_s24  }
 0x331   : > { %s1153_s14 = scalar_lea.sflag [#allocation3], %s1152_s13 }
 0x332   : > { %p1459_p0 = pnand %p1462_p13, %p1649_p6 }
 0x334   : > { %p1460_p1 = pneg %p1459_p0 }
 0x336   : > { %1543 = dma.done.wait (%p1460_p1), %s1153_s14, 16  }
 0x337   : > { %1545 = vsyncadd (%p1460_p1), %s1153_s14, 4294967280  ;;  %p17_p2 = scmp.ge.s32.totalorder %s1632_s30, 4   ;;  %s2031_s24 = smov %s1552_s25 }
 0x338   : > { %s2032_s25 = smov %s1556_s26  ;;  %s2033_s26 = smov %s1643_s10 }
 0x339   : > { %s2034_s27 = smov %s1632_s30  ;;  %19 = sbr.rel (!%p17_p2) target bundleno = 3 (0x3), region = 83 }
 0x33e   :  { %1157 = vsyncpa [#allocation3], 1 }
 0x33f   :  { %1159 = vsyncpa [#allocation3 + $0x1], 1 }

</bundles_post_ra>
